<compile_context>
chip_gen: v6e
topology: v6e:2x2x1
jax: 0.10.0
libtpu: 0.0.40
codegen_flags: <defaults>
</compile_context>

<pallas_src>
import jax
import jax.numpy as jnp
from jax.experimental import pallas as pl
from jax.experimental.pallas import tpu as pltpu


def _round_up(n, m):
    return ((n + m - 1) // m) * m


def _cdiv(a, b):
    return (a + b - 1) // b


def _sublane(dtype):
    # Second-to-last-dim granularity: f32 -> 8, bf16 -> 16, int8/fp8 -> 32.
    return max(8, 32 // jnp.dtype(dtype).itemsize)


def _device_vmem_bytes():
    """Physical per-core VMEM; conservative fallback = v7x's 64 MiB per TC."""
    try:
        info = pltpu.get_tpu_info()
        for attr in ("vmem_capacity_bytes", "vmem_size_bytes", "vmem_bytes"):
            v = getattr(info, attr, None)
            if v:
                return int(v)
    except Exception:
        pass
    return 64 * 1024 * 1024


def _mlp_kernel(x_ref, w1_ref, b1_ref, w2_ref, b2_ref, o_ref):
    # x_ref:  (TB, Dp)                 activation tile (lane-dense, Dp % 128 == 0)
    # w1_ref: (Dp, Hp), b1_ref: (1, Hp)    weights resident across the grid
    # w2_ref: (Hp, Hp), b2_ref: (1, Hp)    (biases kept f32 for the VPU epilogue)
    x = x_ref[...]
    # Layer 1: MXU matmul with f32 accumulation; bias + ReLU in f32 on the VPU.
    h = jnp.dot(x, w1_ref[...], preferred_element_type=jnp.float32) + b1_ref[...]
    h = jnp.maximum(h, 0.0).astype(w2_ref.dtype)  # feed MXU in compute dtype
    # Layer 2: same split.
    y = jnp.dot(h, w2_ref[...], preferred_element_type=jnp.float32) + b2_ref[...]
    o_ref[...] = jnp.maximum(y, 0.0).astype(o_ref.dtype)


def prepare_feature_encoder_params(w1, b1, w2, b2, *, compute_dtype=jnp.bfloat16):
    """Pad + cast the FeatureEncoder weights ONCE (init time), not per forward.

    w1: [D_in, H]  (transposed from PyTorch's [out, in]),  b1: [H]
    w2: [H, H]     (transposed),                            b2: [H]
    compute_dtype: MXU-operand dtype (bf16 by default -- halves weight/x DMA
      bytes and ~3x MXU rate on v5e). Accumulation and bias+ReLU stay f32.
    """
    compute_dtype = jnp.dtype(compute_dtype)
    d_in, hidden = w1.shape
    assert w2.shape == (hidden, hidden) and b1.shape == (hidden,) and b2.shape == (hidden,)

    dp = _round_up(d_in, 128)
    hp = _round_up(hidden, 128)

    # Zero padding is mathematically inert: padded input columns multiply zero
    # weight rows, padded hidden columns get bias 0 and are sliced off.
    w1_p = jnp.pad(w1.astype(compute_dtype), ((0, dp - d_in), (0, hp - hidden)))
    w2_p = jnp.pad(w2.astype(compute_dtype), ((0, hp - hidden), (0, hp - hidden)))
    # Biases stay f32: the epilogue (bias + ReLU) runs in f32 on the VPU.
    b1_p = jnp.pad(b1.astype(jnp.float32), (0, hp - hidden)).reshape(1, hp)
    b2_p = jnp.pad(b2.astype(jnp.float32), (0, hp - hidden)).reshape(1, hp)

    return dict(w1=w1_p, b1=b1_p, w2=w2_p, b2=b2_p,
                d_in=d_in, hidden=hidden, compute_dtype=compute_dtype)


def feature_encoder_forward(x, params, *, out_dtype=None, max_batch_tile=512,
                            single_buffer_weights=None):
    """Fused Linear->ReLU->Linear->ReLU (PyTorch FeatureEncoder.forward).

    x: [..., D_in]; params: output of prepare_feature_encoder_params.
    out_dtype: optional output dtype (e.g. jnp.bfloat16 to halve writeback).
    """
    d_in, hidden = params["d_in"], params["hidden"]
    compute_dtype = jnp.dtype(params["compute_dtype"])
    w1_p, b1_p, w2_p, b2_p = params["w1"], params["b1"], params["w2"], params["b2"]
    dp, hp = w1_p.shape
    assert x.shape[-1] == d_in, "last dim of x must equal input_dim"

    out_dtype = jnp.dtype(out_dtype if out_dtype is not None else x.dtype)
    lead_shape = x.shape[:-1]
    x2d = x.reshape(-1, d_in)
    B = x2d.shape[0]
    if B == 0:  # degenerate / empty batch: nothing to launch
        return jnp.zeros((*lead_shape, hidden), out_dtype)

    cbytes = compute_dtype.itemsize
    obytes = out_dtype.itemsize
    sublane = max(_sublane(compute_dtype), _sublane(out_dtype))

    # Balanced batch tiling: minimize batch padding while amortizing the
    # ~0.35 us per-grid-step overhead (never tiles bigger than max_batch_tile).
    n_tiles = _cdiv(B, max_batch_tile)
    batch_tile = min(_round_up(_cdiv(B, n_tiles), sublane),
                     _round_up(max_batch_tile, sublane))
    # v7x megacore: guarantee >= 2 grid steps so the "parallel" batch axis can
    # actually be split across the two TensorCores (cheap elsewhere: weights
    # stay resident either way).
    if _round_up(B, batch_tile) // batch_tile < 2 and B >= 2 * sublane:
        batch_tile = _round_up(_cdiv(B, 2), sublane)
    Bp = _round_up(B, batch_tile)
    grid = (Bp // batch_tile,)

    # Activation: no-copy fast path when already padded & right dtype; otherwise
    # one pad (fused with the cast) instead of a zeros + dynamic-update-slice.
    x_p = x2d.astype(compute_dtype)
    if Bp != B or dp != d_in:
        x_p = jnp.pad(x_p, ((0, Bp - B), (0, dp - d_in)))

    # Grid-invariant operands: single-buffer them (their index_map is constant,
    # so double buffering is pure VMEM waste). Auto-enabled only when the
    # weights are big enough for it to matter.
    weight_bytes = (dp * hp + hp * hp) * cbytes + 2 * hp * 4
    if single_buffer_weights is None:
        single_buffer_weights = weight_bytes > (1 << 20)
    w_mode = pl.Buffered(1) if single_buffer_weights else None

    def const_spec(shape):
        if w_mode is None:
            return pl.BlockSpec(shape, lambda i: (0, 0))
        return pl.BlockSpec(shape, lambda i: (0, 0), pipeline_mode=w_mode)

    # VMEM budget: x/out double-buffered, weights per buffering mode, f32
    # intermediates (h, y) plus the compute-dtype re-cast of h.
    w_bufs = 1 if single_buffer_weights else 2
    est_vmem = (2 * batch_tile * dp * cbytes            # x tiles (2 bufs)
                + 2 * batch_tile * hp * obytes          # out tiles (2 bufs)
                + w_bufs * weight_bytes                  # resident weights+biases
                + 2 * batch_tile * hp * 4                # f32 h and y
                + batch_tile * hp * cbytes)              # h cast for 2nd matmul
    vmem_cap = _device_vmem_bytes() - (8 << 20)          # leave headroom
    vmem_limit = min(max(int(est_vmem * 1.25), 32 << 20), vmem_cap)
    # TODO(synk): for very large hidden (>= ~3-4K bf16 on v7x's 64 MiB VMEM) add
    # a second grid axis over w2's output columns (h computed once per batch tile
    # into VMEM scratch under pl.when(j == 0)) so resident w2 is Hp*tn, not Hp*Hp.

    out_p = pl.pallas_call(
        _mlp_kernel,
        out_shape=jax.ShapeDtypeStruct((Bp, hp), out_dtype),
        grid_spec=pltpu.PrefetchScalarGridSpec(
            num_scalar_prefetch=0,
            grid=grid,
            in_specs=[
                pl.BlockSpec((batch_tile, dp), lambda i: (i, 0)),  # x tile
                const_spec((dp, hp)),    # w1 (resident)
                const_spec((1, hp)),     # b1 (f32)
                const_spec((hp, hp)),    # w2 (resident)
                const_spec((1, hp)),     # b2 (f32)
            ],
            out_specs=pl.BlockSpec((batch_tile, hp), lambda i: (i, 0)),
        ),
        compiler_params=pltpu.CompilerParams(
            dimension_semantics=("parallel",),   # batch axis -> megacore on v7x
            vmem_limit_bytes=vmem_limit,
        ),
    )(x_p, w1_p, b1_p, w2_p, b2_p)

    out = out_p[:B, :hidden]
    return out.reshape(*lead_shape, hidden)


def _ref_forward(x, w1, b1, w2, b2):
    h = jnp.maximum(x @ w1 + b1, 0.0)
    return jnp.maximum(h @ w2 + b2, 0.0)


if __name__ == "__main__":
    # Small shapes consistent with FeatureEncoder(input_dim=16, hidden_dim=32).
    B, D_IN, H = 16, 16, 32

    key = jax.random.PRNGKey(0)
    kx, k1, kb1, k2, kb2 = jax.random.split(key, 5)

    x = jax.random.normal(kx, (B, D_IN), dtype=jnp.float32)
    # Deterministic synthetic parameters (no checkpoint load), [in, out] layout.
    w1 = jax.random.normal(k1, (D_IN, H), dtype=jnp.float32) * 0.1
    b1 = jax.random.normal(kb1, (H,), dtype=jnp.float32) * 0.1
    w2 = jax.random.normal(k2, (H, H), dtype=jnp.float32) * 0.1
    b2 = jax.random.normal(kb2, (H,), dtype=jnp.float32) * 0.1

    ref = _ref_forward(x, w1, b1, w2, b2)

    # 1) f32 MXU-operand path: tight tolerance vs reference (also exercises a
    #    2-step grid via the megacore split for B=16 / sublane=8).
    params_f32 = prepare_feature_encoder_params(w1, b1, w2, b2,
                                                compute_dtype=jnp.float32)
    out = jax.block_until_ready(feature_encoder_forward(x, params_f32))
    assert out.shape == (B, H)
    assert jnp.allclose(out, ref, atol=1e-5, rtol=1e-5), "f32 mismatch vs reference"

    # 2) Default path: bf16 MXU operands (f32 accumulation), 3-D ragged batch.
    params = prepare_feature_encoder_params(w1, b1, w2, b2)  # bf16 by default
    x3 = x.reshape(2, 8, D_IN)[:, :5, :]                      # (2, 5, 16)
    ref3 = _ref_forward(x3, w1, b1, w2, b2)
    out3 = jax.block_until_ready(feature_encoder_forward(x3, params))
    assert out3.shape == (2, 5, H)
    assert jnp.allclose(out3, ref3, atol=5e-2, rtol=5e-2), "bf16 mismatch vs reference"

    # 3) bf16 output option (halves writeback bytes for bf16 consumers).
    out_bf = jax.block_until_ready(
        feature_encoder_forward(x, params, out_dtype=jnp.bfloat16))
    assert out_bf.shape == (B, H) and out_bf.dtype == jnp.bfloat16
    assert jnp.allclose(out_bf.astype(jnp.float32), ref, atol=5e-2, rtol=5e-2), \
        "bf16-out mismatch vs reference"

    print("KERNEL_OK")
</pallas_src>

<mosaic_0001>
module attributes {stable_mosaic.version = 11 : i64} {
  func.func @_mlp_kernel(%arg0: i32, %arg1: memref<8x128xf32, #tpu.memory_space<vmem>>, %arg2: memref<128x128xf32, #tpu.memory_space<vmem>>, %arg3: memref<1x128xf32, #tpu.memory_space<vmem>>, %arg4: memref<128x128xf32, #tpu.memory_space<vmem>>, %arg5: memref<1x128xf32, #tpu.memory_space<vmem>>, %arg6: memref<8x128xf32, #tpu.memory_space<vmem>>) attributes {dimension_semantics = [#tpu.dimension_semantics<parallel>], iteration_bounds = array<i64: 2>, scalar_prefetch = 0 : i64, scratch_operands = 0 : i64, tpu.core_type = #tpu.core_type<tc>, window_params = [{transform_indices = @transform_0, window_bounds = array<i64: 8, 128>}, {pipeline_mode = #tpu.pipeline_mode<synchronous>, transform_indices = @transform_1, window_bounds = array<i64: 128, 128>}, {pipeline_mode = #tpu.pipeline_mode<synchronous>, transform_indices = @transform_2, window_bounds = array<i64: 1, 128>}, {pipeline_mode = #tpu.pipeline_mode<synchronous>, transform_indices = @transform_3, window_bounds = array<i64: 128, 128>}, {pipeline_mode = #tpu.pipeline_mode<synchronous>, transform_indices = @transform_4, window_bounds = array<i64: 1, 128>}, {transform_indices = @transform_5, window_bounds = array<i64: 8, 128>}]} {
    %c0 = arith.constant 0 : index
    %c0_0 = arith.constant 0 : index
    %0 = vector.load %arg1[%c0, %c0_0] : memref<8x128xf32, #tpu.memory_space<vmem>>, vector<8x128xf32>
    %c0_1 = arith.constant 0 : index
    %c0_2 = arith.constant 0 : index
    %1 = vector.load %arg2[%c0_1, %c0_2] : memref<128x128xf32, #tpu.memory_space<vmem>>, vector<128x128xf32>
    %cst = arith.constant dense<0.000000e+00> : vector<8x128xf32>
    %2 = tpu.matmul %0, %1, %cst {dimension_numbers = #tpu.dot_dimension_numbers<[1], [0], [0], [1], [0, 0, 1, 1], [], []>} : vector<8x128xf32>, vector<128x128xf32>, vector<8x128xf32> -> vector<8x128xf32>
    %c0_3 = arith.constant 0 : index
    %c0_4 = arith.constant 0 : index
    %3 = vector.load %arg3[%c0_3, %c0_4] : memref<1x128xf32, #tpu.memory_space<vmem>>, vector<1x128xf32>
    %4 = vector.broadcast %3 : vector<1x128xf32> to vector<8x128xf32>
    %5 = arith.addf %2, %4 : vector<8x128xf32>
    %cst_5 = arith.constant 0.000000e+00 : f32
    %6 = vector.broadcast %cst_5 : f32 to vector<8x128xf32>
    %7 = arith.maximumf %5, %6 : vector<8x128xf32>
    %c0_6 = arith.constant 0 : index
    %c0_7 = arith.constant 0 : index
    %8 = vector.load %arg4[%c0_6, %c0_7] : memref<128x128xf32, #tpu.memory_space<vmem>>, vector<128x128xf32>
    %cst_8 = arith.constant dense<0.000000e+00> : vector<8x128xf32>
    %9 = tpu.matmul %7, %8, %cst_8 {dimension_numbers = #tpu.dot_dimension_numbers<[1], [0], [0], [1], [0, 0, 1, 1], [], []>} : vector<8x128xf32>, vector<128x128xf32>, vector<8x128xf32> -> vector<8x128xf32>
    %c0_9 = arith.constant 0 : index
    %c0_10 = arith.constant 0 : index
    %10 = vector.load %arg5[%c0_9, %c0_10] : memref<1x128xf32, #tpu.memory_space<vmem>>, vector<1x128xf32>
    %11 = vector.broadcast %10 : vector<1x128xf32> to vector<8x128xf32>
    %12 = arith.addf %9, %11 : vector<8x128xf32>
    %cst_11 = arith.constant 0.000000e+00 : f32
    %13 = vector.broadcast %cst_11 : f32 to vector<8x128xf32>
    %14 = arith.maximumf %12, %13 : vector<8x128xf32>
    %c0_12 = arith.constant 0 : index
    %c0_13 = arith.constant 0 : index
    %15 = vector.load %arg6[%c0_12, %c0_13] : memref<8x128xf32, #tpu.memory_space<vmem>>, vector<8x128xf32>
    tpu.vector_store %arg6[%c0_12, %c0_13], %14 {strides = array<i32>} : memref<8x128xf32, #tpu.memory_space<vmem>>, vector<8x128xf32>,
    return
  }
  func.func @transform_0(%arg0: i32) -> (i32, i32) {
    %c0_i32 = arith.constant 0 : i32
    %c0_i32_0 = arith.constant 0 : i32
    return %arg0, %c0_i32 : i32, i32
  }
  func.func @transform_1(%arg0: i32) -> (i32, i32) {
    %c0_i32 = arith.constant 0 : i32
    %c0_i32_0 = arith.constant 0 : i32
    %c0_i32_1 = arith.constant 0 : i32
    return %c0_i32, %c0_i32_0 : i32, i32
  }
  func.func @transform_2(%arg0: i32) -> (i32, i32) {
    %c0_i32 = arith.constant 0 : i32
    %c0_i32_0 = arith.constant 0 : i32
    %c0_i32_1 = arith.constant 0 : i32
    return %c0_i32, %c0_i32_0 : i32, i32
  }
  func.func @transform_3(%arg0: i32) -> (i32, i32) {
    %c0_i32 = arith.constant 0 : i32
    %c0_i32_0 = arith.constant 0 : i32
    %c0_i32_1 = arith.constant 0 : i32
    return %c0_i32, %c0_i32_0 : i32, i32
  }
  func.func @transform_4(%arg0: i32) -> (i32, i32) {
    %c0_i32 = arith.constant 0 : i32
    %c0_i32_0 = arith.constant 0 : i32
    %c0_i32_1 = arith.constant 0 : i32
    return %c0_i32, %c0_i32_0 : i32, i32
  }
  func.func @transform_5(%arg0: i32) -> (i32, i32) {
    %c0_i32 = arith.constant 0 : i32
    %c0_i32_0 = arith.constant 0 : i32
    return %arg0, %c0_i32 : i32, i32
  }
}

</mosaic_0001>

<bundles_post_ra>
// kernel: tpu_custom_call.1
= control target key start
LH: loop header
LB: loop body
LE: loop exit
PB: predicated region body
PF: predicated region fallthrough
CT: control target
= control target key end

     0   :  { %10 = vsyncpa [#allocation3], 0  ;;  %s1155_s0 = inlined_call_operand.hbm [shape: f32[16,128], index: 0, kind: input, shape index: {}]   ;;  %s1156_s1 = inlined_call_operand.hbm [shape: f32[128,128], index: 1, kind: input, shape index: {}]   ;;  %s1157_s2 = inlined_call_operand.vmem [shape: f32[1,128], index: 2, kind: input, shape index: {}]   ;;  %s1158_s3 = inlined_call_operand.hbm [shape: f32[128,128], index: 3, kind: input, shape index: {}]   ;;  %s1159_s4 = inlined_call_operand.vmem [shape: f32[1,128], index: 4, kind: input, shape index: {}]   ;;  %s1160_s5 = inlined_call_operand.hbm [shape: f32[16,128], index: 5, kind: output, shape index: {}]  }
   0x1   :  { %12 = vsyncpa [#allocation3 + $0x1], 0 }
   0x2   :  { %13 = vsyncpa [#allocation6], 0 }
   0x3   :  { %14 = vsyncpa [#allocation4], 0 }
   0x4   :  { %16 = vsyncpa [#allocation4 + $0x1], 0  ;;  %s943_s18 = smov 0   ;;  %s945_s19 = smov 0  }
   0x5   :  { %s947_s20 = smov 0   ;;  %s949_s21 = smov 0  }
   0x6 LB: > { %s964_s22 = sadd.s32 4294967295, %s903_s21   ;;  %s562_s23 = sadd.s32 4294967294, %s903_s21   ;;  %s903_s21 = sphi %s949_s21, %s1182_s21   ;;  %s899_s20 = sphi %s947_s20, %s1181_s20   ;;  %s895_s19 = sphi %s945_s19, %s1180_s19   ;;  %s891_s18 = sphi %s943_s18, %s1179_s18  }
   0x7   : > { %p42_p0 = scmp.ne.s32.totalorder %s895_s19, %s891_s18  ;;  %p1161_p1 = scmp.eq.s32.totalorder %s964_s22, 0 }
   0x8   : > { %p156_p3 = scmp.eq.s32.totalorder %s562_s23, 1  ;;  %p563_p5 = scmp.ge.s32.totalorder %s903_s21, 1 }
   0x9   : > { %p973_p4 = por %p1161_p1, %p42_p0  ;;  %p163_p7 = scmp.lt.s32.totalorder %s903_s21, 3 }
   0xa   : > { %p978_p6 = por %p156_p3, %p42_p0  ;;  %s905_s27 = smov [#allocation5]  }
   0xb   : > { %s1165_s24 = scalar_select %p973_p4, 1, 0 }
   0xc   : > { %s1166_s25 = scalar_select %p978_p6, 1, 0 }
   0xd   : > { %p983_p8 = pnand %p563_p5, %p163_p7  ;;  %s175_s28 = sshll.u32 %s905_s27, 4  ;;  %s176_s28 = int_to_ptr.vmem [resolvable:$true] %s175_s28 }
   0xe   : > { %s906_s30 = smov [#allocation7]   ;;  %s766_s7 = scalar_lea.vmem %s176_s28, 2048 }
   0xf   : > { %s1167_s26 = scalar_select %p983_p8, 1, 0 }
  0x10   : > { %p696_p9 = pneg %p983_p8  ;;  %s191_s6 = sshll.u32 %s906_s30, 4  ;;  %s192_s6 = int_to_ptr.vmem [resolvable:$true] %s191_s6 }
  0x11   : > { %p767_p13 = scmp.ne.s32.totalorder %s176_s28, %s766_s7  ;;  %p774_p5 = scmp.lt.s32.totalorder %s176_s28, %s176_s28 }
  0x12   : > { %p992_p11 = pnand %p696_p9, %p1161_p1  ;;  %p775_p7 = scmp.lt.s32.totalorder %s766_s7, %s766_s7 }
  0x14   : > { %p757_p12 = pneg %p992_p11  ;;  %p776_p10 = por %p775_p7, %p774_p5 }
  0x16   : > { %p769_p0 = pnand %p767_p13, %p757_p12 }
  0x18   : > { %p770_p3 = pneg %p769_p0 }
  0x1a   : > { %p777_p9 = pnand %p776_p10, %p770_p3 }
  0x1c   : > { %780 = shalt.err (!%p777_p9)
}
  0x1d   : > { %s907_s8 = smov 128   ;;  %s908_s9 = smov 8  }
  0x1e   : > { %699 = dma.hbm_to_vmem [thread:$0]  (!%p992_p11), %s1156_s1, 2048, %s176_s28, [#allocation6], %s907_s8, %s907_s8, %s908_s9  }
  0x1f   : > { %s792_s12 = scalar_lea.vmem %s192_s6, 2048  ;;  %p800_p2 = scmp.lt.s32.totalorder %s192_s6, %s192_s6 }
  0x20   : > { %p793_p1 = scmp.ne.s32.totalorder %s192_s6, %s792_s12  ;;  %p801_p6 = scmp.lt.s32.totalorder %s792_s12, %s792_s12 }
  0x22   : > { %p795_p13 = pnand %p793_p1, %p757_p12  ;;  %p802_p5 = por %p801_p6, %p800_p2 }
  0x24   : > { %p796_p0 = pneg %p795_p13 }
  0x26   : > { %p803_p10 = pnand %p802_p5, %p796_p0 }
  0x28   : > { %806 = shalt.err (!%p803_p10)
}
  0x29   : > { %702 = dma.hbm_to_vmem [thread:$0]  (!%p992_p11), %s1158_s3, 2048, %s192_s6, [#allocation6], %s907_s8, %s907_s8, %s908_s9  }
  0x2a   : > { %s1015_s15 = sadd.s32 1, %s903_s21   ;;  %s29_s16 = sadd.s32 1, %s899_s20 }
  0x2b   : > { %s26_s17 = ssub.s32 %s903_s21, %s1015_s15  ;;  %p36_p1 = scmp.ne.s32.totalorder %s899_s20, %s895_s19 }
  0x2c   : > { %p27_p2 = scmp.eq.s32.totalorder %s26_s17, 0  ;;  %p37_p6 = scmp.eq.s32.totalorder %s903_s21, 0 }
  0x2d   : > { %p1169_p12 = scmp.eq.s32.totalorder %s964_s22, 1  ;;  %p713_p7 = scmp.lt.s32.totalorder %s903_s21, 2 }
  0x2e   : > { %s1031_s27 = scalar_select %p27_p2, %s899_s20, %s29_s16  }
  0x2f   : > { %p1025_p3 = por %p1169_p12, %p36_p1  ;;  %p38_p9 = por %p37_p6, %p36_p1 }
  0x30   : > { %s208_s28 = sand.u32 1, %s899_s20   ;;  %s568_s30 = sshll.u32 %s903_s21, 7 }
  0x31   : > { %s1170_s23 = scalar_select %p1025_p3, 1, 0 }
  0x32   : > { %s567_s29 = sshll.u32 %s208_s28, 3  ;;  %s1038_s8 = scalar_lea.hbm %s1155_s0, %s568_s30 }
  0x33   : > { %s212_s9 = scalar_lea.vmem [#allocation2], %s567_s29  ;;  %p1040_p11 = pnand %p713_p7, %p38_p9 }
  0x34   : > { %s219_s10 = sshll.u32 %s212_s9, 4  ;;  %s209_s12 = scalar_lea.sflag [#allocation3], %s208_s28  ;;  %s220_s10 = int_to_ptr.vmem [resolvable:$true] %s219_s10 }
  0x35   : > { %s807_s13 = scalar_lea.hbm %s1038_s8, 128  ;;  %p809_p0 = pneg %p1040_p11 }
  0x36   : > { %p808_p13 = scmp.ne.s32.totalorder %s1038_s8, %s807_s13  ;;  %s812_s17 = scalar_lea.hbm %s1155_s0, 256 }
  0x37   : > { %p813_p1 = scmp.lt.s32.totalorder %s1038_s8, %s1155_s0  ;;  %p814_p2 = scmp.lt.s32.totalorder %s812_s17, %s807_s13 }
  0x38   : > { %p810_p5 = pnand %p809_p0, %p808_p13 }
  0x39   : > { %p815_p6 = por %p814_p2, %p813_p1 }
  0x3a   : > { %p811_p10 = pneg %p810_p5 }
  0x3c   : > { %p816_p12 = pnand %p815_p6, %p811_p10 }
  0x3e   : > { %819 = shalt.err (!%p816_p12)
}
  0x3f   : > { %s820_s6 = scalar_lea.vmem %s220_s10, 128  ;;  %s909_s28 = smov [#allocation2]  }
  0x40   : > { %p821_p7 = scmp.ne.s32.totalorder %s220_s10, %s820_s6  ;;  %s825_s7 = sshll.u32 %s909_s28, 4  ;;  %s826_s7 = int_to_ptr.vmem [resolvable:$false] %s825_s7 }
  0x41   : > { %s827_s9 = scalar_lea.vmem %s826_s7, 256  ;;  %p828_p13 = scmp.lt.s32.totalorder %s220_s10, %s826_s7 }
  0x42   : > { %p823_p9 = pnand %p821_p7, %p809_p0  ;;  %p829_p5 = scmp.lt.s32.totalorder %s827_s9, %s820_s6 }
  0x44   : > { %p824_p3 = pneg %p823_p9  ;;  %p830_p4 = por %p829_p5, %p828_p13 }
  0x46   : > { %p831_p8 = pnand %p830_p4, %p824_p3 }
  0x48   : > { %834 = shalt.err (!%p831_p8)
}
  0x49   : > { %706 = dma.hbm_to_vmem [thread:$0]  (!%p1040_p11), %s1038_s8, 128, %s220_s10, %s209_s12  }
  0x4a   : > { %p1172_p10 = scmp.ne.s32.totalorder %s1167_s26, 0 }
  0x4b   : > { %s1061_s13 = sand.u32 (!%p1172_p10), 1, %s895_s19   ;;  %p1173_p4 = scmp.ne.s32.totalorder (!%p1172_p10), %s1165_s24, 0 }
  0x4c   : > { %228 = sbr.rel (%p1172_p10) target bundleno = 526 (0x20e), region = 40  ;;  %s570_s14 = sshll.u32 (!%p1172_p10), %s1061_s13, 3 }
  0x4d   : > { %s231_s16 = scalar_lea.sflag (!%p1172_p10), [#allocation3], %s1061_s13  ;;  %s1067_s17 = scalar_lea.vmem (!%p1172_p10), [#allocation2], %s570_s14 }
  0x51   : > { %878 = dma.done.wait (%p1173_p4), %s231_s16, 128  }
  0x52   : > { %880 = vsyncadd (%p1173_p4), %s231_s16, 4294967168  ;;  %p1174_p8 = scmp.eq.s32.totalorder %s964_s22, 0 }
  0x54   : > { %882 = dma.done.wait (%p1174_p8), [#allocation6], 4096   ;;  %p1175_p3 = pmov %p1174_p8 }
  0x55   : > { %v910_v0 = vmov 0.0   ;;  %vm911_vm0 = vmmov 0   ;;  %v285_v1 = vld [vmem:[#allocation5 + $0x78] sm:$0xff]  ;;  %v284_v2 = vld [vmem:[#allocation5 + $0x70] sm:$0xff]  ;;  %v283_v3 = vld [vmem:[#allocation5 + $0x68] sm:$0xff]  ;;  %s577_s11 = sshll.u32 %s964_s22, 7 }
  0x56   : > { %884 = vsyncadd (%p1175_p3), [#allocation6], 4294963200  ;;  %614 = vmatprep.subr.mxu0 %v910_v0  ;;  %646 = vmatprep.mubr.msk.f32.mxu0 %vm911_vm0, %v910_v0  ;;  %v282_v4 = vld [vmem:[#allocation5 + $0x60] sm:$0xff]  ;;  %v379_v5 = vld [vmem:[#allocation7 + $0x78] sm:$0xff]  ;;  %s268_s12 = scalar_lea.vmem [#allocation8], %s570_s14  ;;  %s471_s28 = scalar_lea.hbm %s1160_s5, %s577_s11 }
  0x57   : > { %649 = vmatprep.subr.mxu1 %v910_v0  ;;  %681 = vmatprep.mubr.msk.f32.mxu1 %vm911_vm0, %v910_v0  ;;  %v281_v6 = vld [vmem:[#allocation5 + $0x58] sm:$0xff]  ;;  %v378_v7 = vld [vmem:[#allocation7 + $0x70] sm:$0xff]  ;;  %v377_v8 = vld [vmem:[#allocation7 + $0x68] sm:$0xff]  ;;  %s473_s30 = sshll.u32 %s268_s12, 4  ;;  %s460_s7 = scalar_lea.sflag [#allocation4], %s1061_s13  ;;  %s474_s30 = int_to_ptr.vmem [resolvable:$true] %s473_s30 }
  0x58   : > { %615 = vmatpush3.msra.mxu0 %v285_v1  ;;  %650 = vmatpush3.msra.mxu1 %v379_v5  ;;  %v280_v9 = vld [vmem:[#allocation5 + $0x50] sm:$0xff]  ;;  %v376_v10 = vld [vmem:[#allocation7 + $0x60] sm:$0xff]  ;;  %v279_v11 = vld [vmem:[#allocation5 + $0x48] sm:$0xff]  ;;  %s835_s9 = scalar_lea.vmem %s474_s30, 128  ;;  %p1176_p0 = scmp.ne.s32.totalorder %s1170_s23, 0 }
  0x59   : > { %616 = vmatprep.subr.mxu0 %v910_v0  ;;  %651 = vmatprep.subr.mxu1 %v910_v0  ;;  %v375_v12 = vld [vmem:[#allocation7 + $0x58] sm:$0xff]  ;;  %v278_v13 = vld [vmem:[#allocation5 + $0x40] sm:$0xff]  ;;  %v374_v14 = vld [vmem:[#allocation7 + $0x50] sm:$0xff]  ;;  %p836_p11 = scmp.ne.s32.totalorder %s474_s30, %s835_s9  ;;  %s912_s16 = smov [#allocation8]  }
  0x5a   : > { %617 = vmatpush3.msra.mxu0 %v284_v2  ;;  %652 = vmatpush3.msra.mxu1 %v378_v7  ;;  %v277_v15 = vld [vmem:[#allocation5 + $0x38] sm:$0xff]  ;;  %v373_v16 = vld [vmem:[#allocation7 + $0x48] sm:$0xff]  ;;  %v276_v17 = vld [vmem:[#allocation5 + $0x30] sm:$0xff]  ;;  %s839_s22 = sshll.u32 %s912_s16, 4  ;;  %s840_s22 = int_to_ptr.vmem [resolvable:$false] %s839_s22 }
  0x5b   : > { %618 = vmatprep.subr.mxu0 %v910_v0  ;;  %653 = vmatprep.subr.mxu1 %v910_v0  ;;  %v372_v18 = vld [vmem:[#allocation7 + $0x40] sm:$0xff]  ;;  %v275_v19 = vld [vmem:[#allocation5 + $0x28] sm:$0xff]  ;;  %v371_v20 = vld [vmem:[#allocation7 + $0x38] sm:$0xff]  ;;  %p837_p1 = pnand %p836_p11, %p1176_p0  ;;  %s841_s14 = scalar_lea.vmem %s840_s22, 256 }
  0x5c   : > { %619 = vmatpush3.msra.mxu0 %v283_v3  ;;  %654 = vmatpush3.msra.mxu1 %v377_v8  ;;  %v274_v21 = vld [vmem:[#allocation5 + $0x20] sm:$0xff]  ;;  %v370_v22 = vld [vmem:[#allocation7 + $0x30] sm:$0xff]  ;;  %v273_v23 = vld [vmem:[#allocation5 + $0x18] sm:$0xff]  ;;  %p842_p6 = scmp.lt.s32.totalorder %s474_s30, %s840_s22  ;;  %p843_p12 = scmp.lt.s32.totalorder %s841_s14, %s835_s9 }
  0x5d   : > { %620 = vmatprep.subr.mxu0 %v910_v0  ;;  %655 = vmatprep.subr.mxu1 %v910_v0  ;;  %v369_v24 = vld [vmem:[#allocation7 + $0x28] sm:$0xff]  ;;  %v272_v25 = vld [vmem:[#allocation5 + $0x10] sm:$0xff]  ;;  %v368_v26 = vld [vmem:[#allocation7 + $0x20] sm:$0xff]  ;;  %p838_p2 = pneg %p837_p1 }
  0x5e   : > { %621 = vmatpush3.msra.mxu0 %v282_v4  ;;  %656 = vmatpush3.msra.mxu1 %v376_v10  ;;  %v271_v27 = vld [vmem:[#allocation5 + $0x8] sm:$0xff]  ;;  %v367_v28 = vld [vmem:[#allocation7 + $0x18] sm:$0xff]  ;;  %v270_v29 = vld [vmem:[#allocation5] sm:$0xff]  ;;  %p844_p7 = por %p843_p12, %p842_p6 }
  0x5f   : > { %622 = vmatprep.subr.mxu0 %v910_v0  ;;  %657 = vmatprep.subr.mxu1 %v910_v0  ;;  %v269_v30 = vld [vmem:[%s1067_s17] sm:$0xff]  ;;  %v365_v32 = vld [vmem:[#allocation7 + $0x8] sm:$0xff]  ;;  %v364_v33 = vld [vmem:[#allocation7] sm:$0xff] }
  0x60   : > { %623 = vmatpush3.msra.mxu0 %v281_v6  ;;  %658 = vmatpush3.msra.mxu1 %v375_v12  ;;  %v366_v31 = vld [vmem:[#allocation7 + $0x10] sm:$0xff]  ;;  %p845_p9 = pnand %p844_p7, %p838_p2 }
  0x61   : > { %624 = vmatprep.subr.mxu0 %v910_v0  ;;  %659 = vmatprep.subr.mxu1 %v910_v0  ;;  %v574_v34 = vld [vmem:[%s1157_s2] ss:$0 sm:$0xff] }
  0x62   : > { %625 = vmatpush3.msra.mxu0 %v280_v9  ;;  %660 = vmatpush3.msra.mxu1 %v374_v14  ;;  %v575_v39 = vld [vmem:[%s1159_s4] ss:$0 sm:$0xff] }
  0x63   : > { %626 = vmatprep.subr.mxu0 %v910_v0  ;;  %661 = vmatprep.subr.mxu1 %v910_v0 }
  0x64   : > { %627 = vmatpush3.msra.mxu0 %v279_v11  ;;  %662 = vmatpush3.msra.mxu1 %v373_v16 }
  0x65   : > { %628 = vmatprep.subr.mxu0 %v910_v0  ;;  %663 = vmatprep.subr.mxu1 %v910_v0 }
  0x66   : > { %629 = vmatpush3.msra.mxu0 %v278_v13  ;;  %664 = vmatpush3.msra.mxu1 %v372_v18 }
  0x67   : > { %630 = vmatprep.subr.mxu0 %v910_v0  ;;  %665 = vmatprep.subr.mxu1 %v910_v0 }
  0x68   : > { %631 = vmatpush3.msra.mxu0 %v277_v15  ;;  %666 = vmatpush3.msra.mxu1 %v371_v20 }
  0x69   : > { %632 = vmatprep.subr.mxu0 %v910_v0  ;;  %667 = vmatprep.subr.mxu1 %v910_v0 }
  0x6a   : > { %633 = vmatpush3.msra.mxu0 %v276_v17  ;;  %668 = vmatpush3.msra.mxu1 %v370_v22 }
  0x6b   : > { %634 = vmatprep.subr.mxu0 %v910_v0  ;;  %669 = vmatprep.subr.mxu1 %v910_v0 }
  0x6c   : > { %635 = vmatpush3.msra.mxu0 %v275_v19  ;;  %670 = vmatpush3.msra.mxu1 %v369_v24 }
  0x6d   : > { %636 = vmatprep.subr.mxu0 %v910_v0  ;;  %671 = vmatprep.subr.mxu1 %v910_v0 }
  0x6e   : > { %637 = vmatpush3.msra.mxu0 %v274_v21  ;;  %672 = vmatpush3.msra.mxu1 %v368_v26 }
  0x6f   : > { %638 = vmatprep.subr.mxu0 %v910_v0  ;;  %673 = vmatprep.subr.mxu1 %v910_v0 }
  0x70   : > { %639 = vmatpush3.msra.mxu0 %v273_v23  ;;  %674 = vmatpush3.msra.mxu1 %v367_v28 }
  0x71   : > { %640 = vmatprep.subr.mxu0 %v910_v0  ;;  %675 = vmatprep.subr.mxu1 %v910_v0 }
  0x72   : > { %641 = vmatpush3.msra.mxu0 %v272_v25  ;;  %676 = vmatpush3.msra.mxu1 %v366_v31 }
  0x73   : > { %642 = vmatprep.subr.mxu0 %v910_v0  ;;  %677 = vmatprep.subr.mxu1 %v910_v0 }
  0x74   : > { %643 = vmatpush3.msra.mxu0 %v271_v27  ;;  %678 = vmatpush3.msra.mxu1 %v365_v32 }
  0x75   : > { %644 = vmatprep.subr.mxu0 %v910_v0  ;;  %679 = vmatprep.subr.mxu1 %v910_v0 }
  0x76   : > { %645 = vmatpush3.msra.mxu0 %v270_v29  ;;  %680 = vmatpush3.msra.mxu1 %v364_v33 }
  0x77   : > { %647 = vmatmul.mubr.f32.vlgmr.msra.gmra.mxu0 %v269_v30 }
 0x137   : > { %v359_v35 = vpop.f32.mrf.mxu0 }
 0x138   : > { %v360_v36 = vadd.f32 %v574_v34, %v359_v35 }
 0x139   : > { %v648_v37 = vpop.f32.mrf.mxu0 }
 0x13a   : > { %v363_v38 = vmax.f32 %v360_v36, 0.0 }
 0x13c   : > { %682 = vmatmul.mubr.f32.vlgmr.msra.gmra.mxu1 %v363_v38 }
 0x1fc   : > { %v453_v40 = vpop.f32.mrf.mxu1 }
 0x1fd   : > { %v454_v41 = vadd.f32 %v575_v39, %v453_v40 }
 0x1fe   : > { %v683_v42 = vpop.f32.mrf.mxu1 }
 0x1ff   : > { %v457_v43 = vmax.f32 %v454_v41, 0.0 }
 0x201   : > { %458 = vst [vmem:[%s268_s12] sm:$0xff] %v457_v43 }
 0x202   : > { %848 = shalt.err (!%p845_p9)
}
 0x203   : > { %s849_s17 = scalar_lea.hbm %s471_s28, 128  ;;  %s853_s26 = scalar_lea.hbm %s1160_s5, 256 }
 0x204   : > { %p850_p13 = scmp.ne.s32.totalorder %s471_s28, %s849_s17  ;;  %p854_p4 = scmp.lt.s32.totalorder %s471_s28, %s1160_s5 }
 0x205   : > { %p855_p8 = scmp.lt.s32.totalorder %s853_s26, %s849_s17 }
 0x206   : > { %p851_p5 = pnand %p850_p13, %p1176_p0 }
 0x207   : > { %p856_p3 = por %p855_p8, %p854_p4 }
 0x208   : > { %p852_p10 = pneg %p851_p5 }
 0x20a   : > { %p857_p11 = pnand %p856_p3, %p852_p10 }
 0x20c   : > { %860 = shalt.err (!%p857_p11)
}
 0x20d   : > { %694 = dma.vmem_to_hbm [thread:$0]  (%p1176_p0), %s474_s30, 128, %s471_s28, %s460_s7  }
 0x20e PF: > { %s485_s11 = sand.u32 1, %s891_s18   ;;  %p1177_p1 = scmp.ne.s32.totalorder %s1166_s25, 0 }
 0x20f   : > { %p1178_p2 = scmp.ge.s32.totalorder %s903_s21, 2  ;;  %s486_s12 = scalar_lea.sflag [#allocation4], %s485_s11 }
 0x211   : > { %p708_p6 = pnand %p1178_p2, %p1177_p1 }
 0x213   : > { %p709_p12 = pneg %p708_p6 }
 0x215   : > { %886 = dma.done.wait (%p709_p12), %s486_s12, 128  }
 0x216   : > { %888 = vsyncadd (%p709_p12), %s486_s12, 4294967168  ;;  %p19_p7 = scmp.ge.s32.totalorder %s1015_s15, 4   ;;  %s1179_s18 = smov %s895_s19 }
 0x217   : > { %s1180_s19 = smov %s899_s20  ;;  %s1181_s20 = smov %s1031_s27 }
 0x218   : > { %s1182_s21 = smov %s1015_s15  ;;  %21 = sbr.rel (!%p19_p7) target bundleno = 6 (0x6), region = 93 }
 0x21d   :  { %491 = vsyncpa [#allocation3], 1 }
 0x21e   :  { %493 = vsyncpa [#allocation3 + $0x1], 1 }
 0x21f   :  { %494 = vsyncpa [#allocation6], 1 }
 0x220   :  { %495 = vsyncpa [#allocation4], 1 }
 0x221   :  { %497 = vsyncpa [#allocation4 + $0x1], 1 }

</bundles_post_ra>
